<compile_context>
chip_gen: v6e
topology: v6e:2x2x1
jax: 0.10.0
libtpu: 0.0.40
codegen_flags: <defaults>
</compile_context>

<pallas_src>
import jax
import jax.numpy as jnp
from jax.experimental import pallas as pl
from jax.experimental.pallas import tpu as pltpu

NEG_SLOPE = 0.01  # F.leaky_relu default negative_slope

D_IN = 400
H1, H2, H3 = 100, 25, 5           # true feature widths (PyTorch module)
H1P, H2P, H3P = 128, 128, 128     # lane-dense (padded) widths


def _leaky_relu(x):
    return jnp.where(x > 0, x, NEG_SLOPE * x)


def _round_up(n, m):
    return (n + m - 1) // m * m


def mlp_kernel(x_ref, w1_ref, b1_ref, w2_ref, b2_ref, w3_ref, b3_ref, o_ref):
    """One (TILE_B, 400) batch tile per grid step; weights are VMEM-resident."""
    x = x_ref[...]
    w_dtype = w1_ref.dtype

    # fc1 + leaky_relu   (TILE_B,400) @ (400,128) -> (TILE_B,128)
    h1 = jnp.dot(x, w1_ref[...], preferred_element_type=jnp.float32) + b1_ref[...]
    h1 = _leaky_relu(h1).astype(w_dtype)

    # fc2 + leaky_relu   (TILE_B,128) @ (128,128) -> (TILE_B,128)
    h2 = jnp.dot(h1, w2_ref[...], preferred_element_type=jnp.float32) + b2_ref[...]
    h2 = _leaky_relu(h2).astype(w_dtype)

    # fc3 (no activation)   (TILE_B,128) @ (128,128) -> (TILE_B,128)
    h3 = jnp.dot(h2, w3_ref[...], preferred_element_type=jnp.float32) + b3_ref[...]
    o_ref[...] = h3.astype(o_ref.dtype)  # lane-dense (TILE_B, 128) store


def init_params(key):
    """Deterministic init matching nn.Linear fan-in bounds; stored (in, out)."""
    ks = jax.random.split(key, 6)

    def linear(kw, kb, fan_in, fan_out):
        bound = 1.0 / jnp.sqrt(fan_in)
        w = jax.random.uniform(kw, (fan_in, fan_out), jnp.float32, -bound, bound)
        b = jax.random.uniform(kb, (1, fan_out), jnp.float32, -bound, bound)
        return w, b

    w1, b1 = linear(ks[0], ks[1], D_IN, H1)
    w2, b2 = linear(ks[2], ks[3], H1, H2)
    w3, b3 = linear(ks[4], ks[5], H2, H3)
    return (w1, b1, w2, b2, w3, b3)


def pad_params(params):
    """Zero-pad weights/biases once to lane-dense 128-wide layouts (exact)."""
    w1, b1, w2, b2, w3, b3 = params
    w1p = jnp.zeros((D_IN, H1P), jnp.float32).at[:, :H1].set(w1)
    b1p = jnp.zeros((1, H1P), jnp.float32).at[:, :H1].set(b1)
    w2p = jnp.zeros((H1P, H2P), jnp.float32).at[:H1, :H2].set(w2)
    b2p = jnp.zeros((1, H2P), jnp.float32).at[:, :H2].set(b2)
    w3p = jnp.zeros((H2P, H3P), jnp.float32).at[:H2, :H3].set(w3)
    b3p = jnp.zeros((1, H3P), jnp.float32).at[:, :H3].set(b3)
    return (w1p, b1p, w2p, b2p, w3p, b3p)


def net_forward(x, padded_params, *, tile_b=512, use_bf16=False):
    """x: (B, 400) float32 -> (B, 5) float32.

    tile_b: batch-tile rows per grid step.  512 rows x 400 f32 = ~0.8 MiB per
    input tile; double-buffered plus resident weights stays far under the
    scoped-VMEM default on v5e/v6e/v7x while keeping per-step overhead small.
    """
    w1, b1, w2, b2, w3, b3 = padded_params
    B = x.shape[0]

    # Shrink the tile for small batches; pad batch to a tile multiple so every
    # grid step sees a full, (8,128)-aligned block.
    tile_b = min(tile_b, _round_up(B, 8))
    Bp = _round_up(B, tile_b)
    if Bp != B:
        x = jnp.pad(x, ((0, Bp - B), (0, 0)))

    if use_bf16:
        # bf16 operands, f32 MXU accumulation (preferred_element_type) + f32 bias.
        x = x.astype(jnp.bfloat16)
        w1, w2, w3 = (w.astype(jnp.bfloat16) for w in (w1, w2, w3))

    grid = (Bp // tile_b,)

    def resident(a):  # same block every grid step -> stays in VMEM (no re-DMA)
        return pl.BlockSpec(a.shape, lambda i: (0, 0))

    flops = 2 * Bp * (D_IN * H1P + H1P * H2P + H2P * H3P)
    bytes_accessed = (
        x.size * x.dtype.itemsize
        + sum(a.size * a.dtype.itemsize for a in (w1, b1, w2, b2, w3, b3))
        + Bp * H3P * 4
    )

    out = pl.pallas_call(
        mlp_kernel,
        out_shape=jax.ShapeDtypeStruct((Bp, H3P), jnp.float32),
        grid=grid,
        in_specs=[
            pl.BlockSpec((tile_b, D_IN), lambda i: (i, 0)),
            resident(w1), resident(b1),
            resident(w2), resident(b2),
            resident(w3), resident(b3),
        ],
        out_specs=pl.BlockSpec((tile_b, H3P), lambda i: (i, 0)),
        compiler_params=pltpu.CompilerParams(
            dimension_semantics=("parallel",),  # shard batch tiles across TCs (v7x)
        ),
        cost_estimate=pl.CostEstimate(
            flops=flops, transcendentals=0, bytes_accessed=bytes_accessed),
    )(x, w1, b1, w2, b2, w3, b3)

    # Drop batch padding and the zero-padded output lanes.
    return out[:B, :H3]


def net_forward_ref(x, params):
    """Pure-JAX reference (unpadded weights) for correctness checking."""
    w1, b1, w2, b2, w3, b3 = params
    h = jax.nn.leaky_relu(x @ w1 + b1, NEG_SLOPE)
    h = jax.nn.leaky_relu(h @ w2 + b2, NEG_SLOPE)
    return h @ w3 + b3


if __name__ == "__main__":
    key = jax.random.PRNGKey(0)
    k_params, k_x = jax.random.split(key)

    params = init_params(k_params)
    padded = pad_params(params)

    x = jax.random.normal(k_x, (8, 400), jnp.float32)  # batch=8, features=400

    out = net_forward(x, padded)          # f32 path: exact vs reference
    out = jax.block_until_ready(out)

    ref = net_forward_ref(x, params)
    assert out.shape == (8, 5), out.shape
    assert jnp.allclose(out, ref, atol=1e-5, rtol=1e-5), "mismatch vs reference"

    print("KERNEL_OK")
</pallas_src>

<mosaic_0001>
module attributes {stable_mosaic.version = 11 : i64} {
  func.func @mlp_kernel(%arg0: i32, %arg1: memref<8x400xf32, #tpu.memory_space<vmem>>, %arg2: memref<400x128xf32, #tpu.memory_space<vmem>>, %arg3: memref<1x128xf32, #tpu.memory_space<vmem>>, %arg4: memref<128x128xf32, #tpu.memory_space<vmem>>, %arg5: memref<1x128xf32, #tpu.memory_space<vmem>>, %arg6: memref<128x128xf32, #tpu.memory_space<vmem>>, %arg7: memref<1x128xf32, #tpu.memory_space<vmem>>, %arg8: memref<8x128xf32, #tpu.memory_space<vmem>>) attributes {dimension_semantics = [#tpu.dimension_semantics<parallel>], iteration_bounds = array<i64: 1>, scalar_prefetch = 0 : i64, scratch_operands = 0 : i64, tpu.core_type = #tpu.core_type<tc>, window_params = [{transform_indices = @transform_0, window_bounds = array<i64: 8, 400>}, {pipeline_mode = #tpu.pipeline_mode<synchronous>, transform_indices = @transform_1, window_bounds = array<i64: 400, 128>}, {pipeline_mode = #tpu.pipeline_mode<synchronous>, transform_indices = @transform_2, window_bounds = array<i64: 1, 128>}, {pipeline_mode = #tpu.pipeline_mode<synchronous>, transform_indices = @transform_3, window_bounds = array<i64: 128, 128>}, {pipeline_mode = #tpu.pipeline_mode<synchronous>, transform_indices = @transform_4, window_bounds = array<i64: 1, 128>}, {pipeline_mode = #tpu.pipeline_mode<synchronous>, transform_indices = @transform_5, window_bounds = array<i64: 128, 128>}, {pipeline_mode = #tpu.pipeline_mode<synchronous>, transform_indices = @transform_6, window_bounds = array<i64: 1, 128>}, {transform_indices = @transform_7, window_bounds = array<i64: 8, 128>}]} {
    %c0 = arith.constant 0 : index
    %c0_0 = arith.constant 0 : index
    %0 = vector.load %arg1[%c0, %c0_0] : memref<8x400xf32, #tpu.memory_space<vmem>>, vector<8x400xf32>
    %c0_1 = arith.constant 0 : index
    %c0_2 = arith.constant 0 : index
    %1 = vector.load %arg2[%c0_1, %c0_2] : memref<400x128xf32, #tpu.memory_space<vmem>>, vector<400x128xf32>
    %cst = arith.constant dense<0.000000e+00> : vector<8x128xf32>
    %2 = tpu.matmul %0, %1, %cst {dimension_numbers = #tpu.dot_dimension_numbers<[1], [0], [0], [1], [0, 0, 1, 1], [], []>} : vector<8x400xf32>, vector<400x128xf32>, vector<8x128xf32> -> vector<8x128xf32>
    %c0_3 = arith.constant 0 : index
    %c0_4 = arith.constant 0 : index
    %3 = vector.load %arg3[%c0_3, %c0_4] : memref<1x128xf32, #tpu.memory_space<vmem>>, vector<1x128xf32>
    %4 = vector.broadcast %3 : vector<1x128xf32> to vector<8x128xf32>
    %5 = arith.addf %2, %4 : vector<8x128xf32>
    %cst_5 = arith.constant 0.000000e+00 : f32
    %6 = vector.broadcast %cst_5 : f32 to vector<8x128xf32>
    %7 = arith.cmpf ogt, %5, %6 : vector<8x128xf32>
    %cst_6 = arith.constant 0.00999999977 : f32
    %8 = vector.broadcast %cst_6 : f32 to vector<8x128xf32>
    %9 = arith.mulf %8, %5 : vector<8x128xf32>
    %10 = arith.select %7, %5, %9 : vector<8x128xi1>, vector<8x128xf32>
    %c0_7 = arith.constant 0 : index
    %c0_8 = arith.constant 0 : index
    %11 = vector.load %arg4[%c0_7, %c0_8] : memref<128x128xf32, #tpu.memory_space<vmem>>, vector<128x128xf32>
    %cst_9 = arith.constant dense<0.000000e+00> : vector<8x128xf32>
    %12 = tpu.matmul %10, %11, %cst_9 {dimension_numbers = #tpu.dot_dimension_numbers<[1], [0], [0], [1], [0, 0, 1, 1], [], []>} : vector<8x128xf32>, vector<128x128xf32>, vector<8x128xf32> -> vector<8x128xf32>
    %c0_10 = arith.constant 0 : index
    %c0_11 = arith.constant 0 : index
    %13 = vector.load %arg5[%c0_10, %c0_11] : memref<1x128xf32, #tpu.memory_space<vmem>>, vector<1x128xf32>
    %14 = vector.broadcast %13 : vector<1x128xf32> to vector<8x128xf32>
    %15 = arith.addf %12, %14 : vector<8x128xf32>
    %cst_12 = arith.constant 0.000000e+00 : f32
    %16 = vector.broadcast %cst_12 : f32 to vector<8x128xf32>
    %17 = arith.cmpf ogt, %15, %16 : vector<8x128xf32>
    %cst_13 = arith.constant 0.00999999977 : f32
    %18 = vector.broadcast %cst_13 : f32 to vector<8x128xf32>
    %19 = arith.mulf %18, %15 : vector<8x128xf32>
    %20 = arith.select %17, %15, %19 : vector<8x128xi1>, vector<8x128xf32>
    %c0_14 = arith.constant 0 : index
    %c0_15 = arith.constant 0 : index
    %21 = vector.load %arg6[%c0_14, %c0_15] : memref<128x128xf32, #tpu.memory_space<vmem>>, vector<128x128xf32>
    %cst_16 = arith.constant dense<0.000000e+00> : vector<8x128xf32>
    %22 = tpu.matmul %20, %21, %cst_16 {dimension_numbers = #tpu.dot_dimension_numbers<[1], [0], [0], [1], [0, 0, 1, 1], [], []>} : vector<8x128xf32>, vector<128x128xf32>, vector<8x128xf32> -> vector<8x128xf32>
    %c0_17 = arith.constant 0 : index
    %c0_18 = arith.constant 0 : index
    %23 = vector.load %arg7[%c0_17, %c0_18] : memref<1x128xf32, #tpu.memory_space<vmem>>, vector<1x128xf32>
    %24 = vector.broadcast %23 : vector<1x128xf32> to vector<8x128xf32>
    %25 = arith.addf %22, %24 : vector<8x128xf32>
    %c0_19 = arith.constant 0 : index
    %c0_20 = arith.constant 0 : index
    %26 = vector.load %arg8[%c0_19, %c0_20] : memref<8x128xf32, #tpu.memory_space<vmem>>, vector<8x128xf32>
    tpu.vector_store %arg8[%c0_19, %c0_20], %25 {strides = array<i32>} : memref<8x128xf32, #tpu.memory_space<vmem>>, vector<8x128xf32>,
    return
  }
  func.func @transform_0(%arg0: i32) -> (i32, i32) {
    %c0_i32 = arith.constant 0 : i32
    %c0_i32_0 = arith.constant 0 : i32
    return %arg0, %c0_i32 : i32, i32
  }
  func.func @transform_1(%arg0: i32) -> (i32, i32) {
    %c0_i32 = arith.constant 0 : i32
    %c0_i32_0 = arith.constant 0 : i32
    %c0_i32_1 = arith.constant 0 : i32
    return %c0_i32, %c0_i32_0 : i32, i32
  }
  func.func @transform_2(%arg0: i32) -> (i32, i32) {
    %c0_i32 = arith.constant 0 : i32
    %c0_i32_0 = arith.constant 0 : i32
    %c0_i32_1 = arith.constant 0 : i32
    return %c0_i32, %c0_i32_0 : i32, i32
  }
  func.func @transform_3(%arg0: i32) -> (i32, i32) {
    %c0_i32 = arith.constant 0 : i32
    %c0_i32_0 = arith.constant 0 : i32
    %c0_i32_1 = arith.constant 0 : i32
    return %c0_i32, %c0_i32_0 : i32, i32
  }
  func.func @transform_4(%arg0: i32) -> (i32, i32) {
    %c0_i32 = arith.constant 0 : i32
    %c0_i32_0 = arith.constant 0 : i32
    %c0_i32_1 = arith.constant 0 : i32
    return %c0_i32, %c0_i32_0 : i32, i32
  }
  func.func @transform_5(%arg0: i32) -> (i32, i32) {
    %c0_i32 = arith.constant 0 : i32
    %c0_i32_0 = arith.constant 0 : i32
    %c0_i32_1 = arith.constant 0 : i32
    return %c0_i32, %c0_i32_0 : i32, i32
  }
  func.func @transform_6(%arg0: i32) -> (i32, i32) {
    %c0_i32 = arith.constant 0 : i32
    %c0_i32_0 = arith.constant 0 : i32
    %c0_i32_1 = arith.constant 0 : i32
    return %c0_i32, %c0_i32_0 : i32, i32
  }
  func.func @transform_7(%arg0: i32) -> (i32, i32) {
    %c0_i32 = arith.constant 0 : i32
    %c0_i32_0 = arith.constant 0 : i32
    return %arg0, %c0_i32 : i32, i32
  }
}

</mosaic_0001>

<bundles_post_ra>
// kernel: tpu_custom_call.1
= control target key start
LH: loop header
LB: loop body
LE: loop exit
PB: predicated region body
PF: predicated region fallthrough
CT: control target
= control target key end

     0   :  { %12 = vsyncpa [#allocation3], 0  ;;  %s889_s0 = inlined_call_operand.hbm [shape: f32[8,400], index: 0, kind: input, shape index: {}]   ;;  %s890_s1 = inlined_call_operand.hbm [shape: f32[400,128], index: 1, kind: input, shape index: {}]   ;;  %s891_s2 = inlined_call_operand.vmem [shape: f32[1,128], index: 2, kind: input, shape index: {}]   ;;  %s892_s3 = inlined_call_operand.hbm [shape: f32[128,128], index: 3, kind: input, shape index: {}]   ;;  %s893_s4 = inlined_call_operand.vmem [shape: f32[1,128], index: 4, kind: input, shape index: {}]   ;;  %s894_s5 = inlined_call_operand.hbm [shape: f32[128,128], index: 5, kind: input, shape index: {}]   ;;  %s895_s6 = inlined_call_operand.vmem [shape: f32[1,128], index: 6, kind: input, shape index: {}]   ;;  %s896_s7 = inlined_call_operand.hbm [shape: f32[8,128], index: 7, kind: output, shape index: {}]  }
   0x1   :  { %13 = vsyncpa [#allocation6], 0 }
   0x2   :  { %14 = vsyncpa [#allocation9], 0 }
   0x3   :  { %15 = vsyncpa [#allocation4], 0  ;;  %s755_s24 = smov [#allocation5]  }
   0x4   :  { %s31_s25 = sshll.u32 %s755_s24, 4  ;;  %s32_s25 = int_to_ptr.vmem [resolvable:$true] %s31_s25 }
   0x5   :  { %s655_s26 = scalar_lea.vmem %s32_s25, 6400  ;;  %p660_p1 = scmp.lt.s32.totalorder %s32_s25, %s32_s25 }
   0x6   :  { %p656_p0 = scmp.ne.s32.totalorder %s32_s25, %s655_s26  ;;  %p661_p2 = scmp.lt.s32.totalorder %s655_s26, %s655_s26 }
   0x8   :  { %p662_p3 = por %p661_p2, %p660_p1 }
   0xa   :  { %p663_p4 = pnand %p662_p3, %p656_p0 }
   0xc   :  { %666 = shalt.err (!%p663_p4)
}
   0xd   :  { %s756_s27 = smov 128   ;;  %s757_s28 = smov 8  }
   0xe   :  { %37 = dma.hbm_to_vmem [thread:$0]  %s890_s1, 6400, %s32_s25, [#allocation6], %s756_s27, %s756_s27, %s757_s28  }
   0xf   :  { %s758_s8 = smov [#allocation2]   ;;  %s759_s10 = smov [#allocation7]  }
  0x10   :  { %s22_s9 = sshll.u32 %s758_s8, 4  ;;  %s45_s11 = sshll.u32 %s759_s10, 4  ;;  %s23_s9 = int_to_ptr.vmem [resolvable:$true] %s22_s9  ;;  %s46_s11 = int_to_ptr.vmem [resolvable:$true] %s45_s11 }
  0x11   :  { %s675_s12 = scalar_lea.vmem %s23_s9, 512  ;;  %p680_p6 = scmp.lt.s32.totalorder %s23_s9, %s23_s9 }
  0x12   :  { %p676_p5 = scmp.ne.s32.totalorder %s23_s9, %s675_s12  ;;  %p681_p7 = scmp.lt.s32.totalorder %s675_s12, %s675_s12 }
  0x14   :  { %p682_p8 = por %p681_p7, %p680_p6 }
  0x16   :  { %p683_p9 = pnand %p682_p8, %p676_p5 }
  0x18   :  { %686 = shalt.err (!%p683_p9)
}
  0x19   :  { %25 = dma.hbm_to_vmem [thread:$0]  %s889_s0, 512, %s23_s9, [#allocation3]  }
  0x1a   :  { %s695_s15 = scalar_lea.vmem %s46_s11, 2048  ;;  %p700_p11 = scmp.lt.s32.totalorder %s46_s11, %s46_s11 }
  0x1b   :  { %p696_p10 = scmp.ne.s32.totalorder %s46_s11, %s695_s15  ;;  %p701_p12 = scmp.lt.s32.totalorder %s695_s15, %s695_s15 }
  0x1d   :  { %p702_p13 = por %p701_p12, %p700_p11 }
  0x1f   :  { %p703_p0 = pnand %p702_p13, %p696_p10 }
  0x21   :  { %706 = shalt.err (!%p703_p0)
}
  0x22   :  { %51 = dma.hbm_to_vmem [thread:$0]  %s892_s3, 2048, %s46_s11, [#allocation6], %s756_s27, %s756_s27, %s757_s28  }
  0x23   :  { %s760_s17 = smov [#allocation8]  }
  0x24   :  { %s59_s18 = sshll.u32 %s760_s17, 4  ;;  %s60_s18 = int_to_ptr.vmem [resolvable:$true] %s59_s18 }
  0x25   :  { %s715_s19 = scalar_lea.vmem %s60_s18, 2048  ;;  %p720_p2 = scmp.lt.s32.totalorder %s60_s18, %s60_s18 }
  0x26   :  { %p716_p1 = scmp.ne.s32.totalorder %s60_s18, %s715_s19  ;;  %p721_p3 = scmp.lt.s32.totalorder %s715_s19, %s715_s19 }
  0x28   :  { %p722_p4 = por %p721_p3, %p720_p2 }
  0x2a   :  { %p723_p5 = pnand %p722_p4, %p716_p1 }
  0x2c   :  { %726 = shalt.err (!%p723_p5)
}
  0x2d   :  { %65 = dma.hbm_to_vmem [thread:$0]  %s894_s5, 2048, %s60_s18, [#allocation9], %s756_s27, %s756_s27, %s757_s28  }
  0x2e   :  { %747 = dma.done.wait [#allocation3], 512  }
  0x2f   :  { %748 = vsyncadd [#allocation3], 4294966784 }
  0x30   :  { %749 = dma.done.wait [#allocation6], 8448  }
  0x31   :  { %750 = vsyncadd [#allocation6], 4294958848 }
  0x32   :  { %751 = dma.done.wait [#allocation9], 2048  }
  0x33   :  { %752 = vsyncadd [#allocation9], 4294965248  ;;  %v761_v0 = vmov 0.0   ;;  %v115_v1 = vld [vmem:[#allocation5 + $0xf8] sm:$0xff]  ;;  %v114_v4 = vld [vmem:[#allocation5 + $0xf0] sm:$0xff]  ;;  %vm141_vm0 = vcmask 130048  }
  0x34   :  { %215 = vmatprep.subr.mxu1 %v761_v0  ;;  %v99_v2 = vld [vmem:[#allocation5 + $0x78] sm:$0xff]  ;;  %499 = vmatprep.subr.mxu0 %v115_v1  ;;  %v98_v5 = vld [vmem:[#allocation5 + $0x70] sm:$0xff]  ;;  %v113_v7 = vld [vmem:[#allocation5 + $0xe8] sm:$0xff]  ;;  %vm762_vm1 = vmmov 0   ;;  %s763_s24 = smov [#allocation10]  }
  0x35   :  { %v131_v3 = vld [vmem:[#allocation5 + $0x178] sm:$0xff]  ;;  %v130_v6 = vld [vmem:[#allocation5 + $0x170] sm:$0xff]  ;;  %500 = vmatpush3.msra.mxu0 %v99_v2  ;;  %v129_v8 = vld [vmem:[#allocation5 + $0x168] sm:$0xff]  ;;  %s484_s25 = sshll.u32 %s763_s24, 4  ;;  %s485_s25 = int_to_ptr.vmem [resolvable:$true] %s484_s25 }
  0x36   :  { %216 = vmatpush1.msra.mxu1 %v131_v3  ;;  %501 = vmatprep.subr.mxu0 %v114_v4  ;;  %v97_v9 = vld [vmem:[#allocation5 + $0x68] sm:$0xff]  ;;  %v112_v10 = vld [vmem:[#allocation5 + $0xe0] sm:$0xff]  ;;  %v111_v13 = vld [vmem:[#allocation5 + $0xd8] sm:$0xff]  ;;  %s727_s26 = scalar_lea.vmem %s485_s25, 128  ;;  %p732_p7 = scmp.lt.s32.totalorder %s485_s25, %s485_s25 }
  0x37   :  { %217 = vmatprep.subr.mxu1 %v761_v0  ;;  %502 = vmatpush3.msra.mxu0 %v98_v5  ;;  %v128_v11 = vld [vmem:[#allocation5 + $0x160] sm:$0xff]  ;;  %v127_v14 = vld [vmem:[#allocation5 + $0x158] sm:$0xff]  ;;  %v110_v16 = vld [vmem:[#allocation5 + $0xd0] sm:$0xff]  ;;  %p728_p6 = scmp.ne.s32.totalorder %s485_s25, %s727_s26  ;;  %p733_p8 = scmp.lt.s32.totalorder %s727_s26, %s727_s26 }
  0x38   :  { %218 = vmatpush1.msra.mxu1 %v130_v6  ;;  %503 = vmatprep.subr.mxu0 %v113_v7  ;;  %v96_v12 = vld [vmem:[#allocation5 + $0x60] sm:$0xff]  ;;  %v95_v15 = vld [vmem:[#allocation5 + $0x58] sm:$0xff]  ;;  %v126_v17 = vld [vmem:[#allocation5 + $0x150] sm:$0xff] }
  0x39   :  { %219 = vmatprep.subr.mxu1 %v761_v0  ;;  %504 = vmatpush3.msra.mxu0 %v97_v9  ;;  %v94_v18 = vld [vmem:[#allocation5 + $0x50] sm:$0xff]  ;;  %v109_v19 = vld [vmem:[#allocation5 + $0xc8] sm:$0xff]  ;;  %v108_v22 = vld [vmem:[#allocation5 + $0xc0] sm:$0xff]  ;;  %p734_p9 = por %p733_p8, %p732_p7 }
  0x3a   :  { %220 = vmatpush1.msra.mxu1 %v129_v8  ;;  %505 = vmatprep.subr.mxu0 %v112_v10  ;;  %v125_v20 = vld [vmem:[#allocation5 + $0x148] sm:$0xff]  ;;  %v124_v23 = vld [vmem:[#allocation5 + $0x140] sm:$0xff]  ;;  %v107_v25 = vld [vmem:[#allocation5 + $0xb8] sm:$0xff] }
  0x3b   :  { %221 = vmatprep.subr.mxu1 %v761_v0  ;;  %506 = vmatpush3.msra.mxu0 %v96_v12  ;;  %v93_v21 = vld [vmem:[#allocation5 + $0x48] sm:$0xff]  ;;  %v92_v24 = vld [vmem:[#allocation5 + $0x40] sm:$0xff]  ;;  %v123_v26 = vld [vmem:[#allocation5 + $0x138] sm:$0xff]  ;;  %p735_p10 = pnand %p734_p9, %p728_p6 }
  0x3c   :  { %222 = vmatpush1.msra.mxu1 %v128_v11  ;;  %507 = vmatprep.subr.mxu0 %v111_v13  ;;  %v91_v27 = vld [vmem:[#allocation5 + $0x38] sm:$0xff]  ;;  %v106_v28 = vld [vmem:[#allocation5 + $0xb0] sm:$0xff]  ;;  %v105_v31 = vld [vmem:[#allocation5 + $0xa8] sm:$0xff] }
  0x3d   :  { %223 = vmatprep.subr.mxu1 %v761_v0  ;;  %508 = vmatpush3.msra.mxu0 %v95_v15  ;;  %v122_v29 = vld [vmem:[#allocation5 + $0x130] sm:$0xff]  ;;  %v121_v32 = vld [vmem:[#allocation5 + $0x128] sm:$0xff]  ;;  %v104_v34 = vld [vmem:[#allocation5 + $0xa0] sm:$0xff] }
  0x3e   :  { %224 = vmatpush1.msra.mxu1 %v127_v14  ;;  %509 = vmatprep.subr.mxu0 %v110_v16  ;;  %v90_v30 = vld [vmem:[#allocation5 + $0x30] sm:$0xff]  ;;  %v89_v33 = vld [vmem:[#allocation5 + $0x28] sm:$0xff]  ;;  %v120_v35 = vld [vmem:[#allocation5 + $0x120] sm:$0xff] }
  0x3f   :  { %225 = vmatprep.subr.mxu1 %v761_v0  ;;  %510 = vmatpush3.msra.mxu0 %v94_v18  ;;  %v88_v36 = vld [vmem:[#allocation5 + $0x20] sm:$0xff]  ;;  %v103_v37 = vld [vmem:[#allocation5 + $0x98] sm:$0xff]  ;;  %v102_v40 = vld [vmem:[#allocation5 + $0x90] sm:$0xff] }
  0x40   :  { %226 = vmatpush1.msra.mxu1 %v126_v17  ;;  %511 = vmatprep.subr.mxu0 %v109_v19  ;;  %v119_v38 = vld [vmem:[#allocation5 + $0x118] sm:$0xff]  ;;  %v118_v41 = vld [vmem:[#allocation5 + $0x110] sm:$0xff]  ;;  %v101_v43 = vld [vmem:[#allocation5 + $0x88] sm:$0xff] }
  0x41   :  { %227 = vmatprep.subr.mxu1 %v761_v0  ;;  %512 = vmatpush3.msra.mxu0 %v93_v21  ;;  %v87_v39 = vld [vmem:[#allocation5 + $0x18] sm:$0xff]  ;;  %v86_v42 = vld [vmem:[#allocation5 + $0x10] sm:$0xff]  ;;  %v117_v44 = vld [vmem:[#allocation5 + $0x108] sm:$0xff] }
  0x42   :  { %228 = vmatpush1.msra.mxu1 %v125_v20  ;;  %513 = vmatprep.subr.mxu0 %v108_v22  ;;  %v85_v45 = vld [vmem:[#allocation5 + $0x8] sm:$0xff]  ;;  %v100_v46 = vld [vmem:[#allocation5 + $0x80] sm:$0xff]  ;;  %v83_v52 = vld [vmem:[#allocation2 + $0x18] sm:$0xff] }
  0x43   :  { %229 = vmatprep.subr.mxu1 %v761_v0  ;;  %514 = vmatpush3.msra.mxu0 %v92_v24  ;;  %v81_v47 = vld [vmem:[#allocation2 + $0x8] sm:$0xff]  ;;  %v84_v48 = vld [vmem:[#allocation5] sm:$0xff]  ;;  %v82_v55 = vld [vmem:[#allocation2 + $0x10] sm:$0xff] }
  0x44   :  { %230 = vmatpush1.msra.mxu1 %v124_v23  ;;  %515 = vmatprep.subr.mxu0 %v107_v25  ;;  %v116_v49 = vld [vmem:[#allocation5 + $0x100] sm:$0xff]  ;;  %v133_v51 = vld [vmem:[#allocation5 + $0x188] sm:$0xff]  ;;  %v301_v57 = vld [vmem:[#allocation7 + $0x68] sm:$0xff] }
  0x45   :  { %231 = vmatprep.subr.mxu1 %v761_v0  ;;  %516 = vmatpush3.msra.mxu0 %v91_v27  ;;  %v80_v50 = vld [vmem:[#allocation2] sm:$0xff]  ;;  %v303_v54 = vld [vmem:[#allocation7 + $0x78] sm:$0xff]  ;;  %v300_v58 = vld [vmem:[#allocation7 + $0x60] sm:$0xff] }
  0x46   :  { %232 = vmatpush1.msra.mxu1 %v123_v26  ;;  %517 = vmatprep.subr.mxu0 %v106_v28  ;;  %v132_v53 = vld [vmem:[#allocation5 + $0x180] sm:$0xff]  ;;  %v299_v59 = vld [vmem:[#allocation7 + $0x58] sm:$0xff]  ;;  %v297_v61 = vld [vmem:[#allocation7 + $0x48] sm:$0xff] }
  0x47   :  { %233 = vmatprep.subr.mxu1 %v761_v0  ;;  %518 = vmatpush3.msra.mxu0 %v90_v30  ;;  %v302_v56 = vld [vmem:[#allocation7 + $0x70] sm:$0xff]  ;;  %v296_v62 = vld [vmem:[#allocation7 + $0x40] sm:$0xff]  ;;  %v295_v63 = vld [vmem:[#allocation7 + $0x38] sm:$0xff] }
  0x48   :  { %234 = vmatpush1.msra.mxu1 %v122_v29  ;;  %519 = vmatprep.subr.mxu0 %v105_v31  ;;  %v298_v60 = vld [vmem:[#allocation7 + $0x50] sm:$0xff]  ;;  %v293_v2 = vld [vmem:[#allocation7 + $0x28] sm:$0xff]  ;;  %v292_v3 = vld [vmem:[#allocation7 + $0x20] sm:$0xff] }
  0x49   :  { %235 = vmatprep.subr.mxu1 %v761_v0  ;;  %520 = vmatpush3.msra.mxu0 %v89_v33  ;;  %v294_v1 = vld [vmem:[#allocation7 + $0x30] sm:$0xff]  ;;  %v291_v4 = vld [vmem:[#allocation7 + $0x18] sm:$0xff]  ;;  %v289_v6 = vld [vmem:[#allocation7 + $0x8] sm:$0xff] }
  0x4a   :  { %236 = vmatpush1.msra.mxu1 %v121_v32  ;;  %521 = vmatprep.subr.mxu0 %v104_v34  ;;  %v290_v5 = vld [vmem:[#allocation7 + $0x10] sm:$0xff]  ;;  %v288_v7 = vld [vmem:[#allocation7] sm:$0xff]  ;;  %v399_v8 = vld [vmem:[#allocation8 + $0x78] sm:$0xff] }
  0x4b   :  { %237 = vmatprep.subr.mxu1 %v761_v0  ;;  %522 = vmatpush3.msra.mxu0 %v88_v36  ;;  %v398_v9 = vld [vmem:[#allocation8 + $0x70] sm:$0xff]  ;;  %v397_v10 = vld [vmem:[#allocation8 + $0x68] sm:$0xff]  ;;  %v396_v11 = vld [vmem:[#allocation8 + $0x60] sm:$0xff] }
  0x4c   :  { %238 = vmatpush1.msra.mxu1 %v120_v35  ;;  %523 = vmatprep.subr.mxu0 %v103_v37  ;;  %v395_v12 = vld [vmem:[#allocation8 + $0x58] sm:$0xff]  ;;  %v394_v13 = vld [vmem:[#allocation8 + $0x50] sm:$0xff]  ;;  %v393_v14 = vld [vmem:[#allocation8 + $0x48] sm:$0xff] }
  0x4d   :  { %239 = vmatprep.subr.mxu1 %v761_v0  ;;  %524 = vmatpush3.msra.mxu0 %v87_v39  ;;  %v392_v15 = vld [vmem:[#allocation8 + $0x40] sm:$0xff]  ;;  %v391_v16 = vld [vmem:[#allocation8 + $0x38] sm:$0xff]  ;;  %v390_v17 = vld [vmem:[#allocation8 + $0x30] sm:$0xff] }
  0x4e   :  { %240 = vmatpush1.msra.mxu1 %v119_v38  ;;  %525 = vmatprep.subr.mxu0 %v102_v40  ;;  %v389_v18 = vld [vmem:[#allocation8 + $0x28] sm:$0xff]  ;;  %v388_v19 = vld [vmem:[#allocation8 + $0x20] sm:$0xff]  ;;  %v387_v20 = vld [vmem:[#allocation8 + $0x18] sm:$0xff] }
  0x4f   :  { %241 = vmatprep.subr.mxu1 %v761_v0  ;;  %526 = vmatpush3.msra.mxu0 %v86_v42  ;;  %v495_v23 = vld [vmem:[%s891_s2] ss:$0 sm:$0xff]  ;;  %v385_v32 = vld [vmem:[#allocation8 + $0x8] sm:$0xff]  ;;  %v384_v33 = vld [vmem:[#allocation8] sm:$0xff] }
  0x50   :  { %242 = vmatpush1.msra.mxu1 %v118_v41  ;;  %527 = vmatprep.subr.mxu0 %v101_v43  ;;  %v386_v31 = vld [vmem:[#allocation8 + $0x10] sm:$0xff] }
  0x51   :  { %243 = vmatprep.subr.mxu1 %v761_v0  ;;  %528 = vmatpush3.msra.mxu0 %v85_v45  ;;  %v497_v34 = vld [vmem:[%s893_s4] ss:$0 sm:$0xff] }
  0x52   :  { %244 = vmatpush1.msra.mxu1 %v117_v44  ;;  %529 = vmatprep.subr.mxu0 %v100_v46  ;;  %v498_v40 = vld [vmem:[%s895_s6] ss:$0 sm:$0xff] }
  0x53   :  { %245 = vmatprep.subr.mxu1 %v761_v0  ;;  %209 = vmatprep.mubr.f32.mxu0 %v81_v47 }
  0x54   :  { %530 = vmatpush3.msra.mxu0 %v84_v48  ;;  %246 = vmatpush1.msra.mxu1 %v116_v49 }
  0x55   :  { %210 = vmatmul.mubr.f32.vlgmr.msra.gmra.mxu0 %v80_v50  ;;  %275 = vmatprep.subr.mxu1 %v761_v0 }
  0x56   :  { %276 = vmatpush2.msra.mxu1 %v133_v51  ;;  %496 = vmatprep.mubr.msk.f32.mxu1 %vm141_vm0, %v83_v52 }
  0x57   :  { %277 = vmatprep.subr.mxu1 %v761_v0  ;;  %568 = vmatprep.subr.mxu0 %v761_v0 }
  0x58   :  { %278 = vmatpush2.msra.mxu1 %v132_v53  ;;  %569 = vmatpush3.msra.mxu0 %v303_v54 }
  0x59   :  { %280 = vmatmul.mubr.f32.vlgmr.msra.gmra.mxu1 %v82_v55  ;;  %570 = vmatprep.subr.mxu0 %v761_v0 }
  0x5a   :  { %571 = vmatpush3.msra.mxu0 %v302_v56  ;;  %603 = vmatprep.subr.mxu1 %v761_v0 }
  0x5b   :  { %572 = vmatprep.subr.mxu0 %v761_v0  ;;  %600 = vmatprep.mubr.msk.f32.mxu0 %vm762_vm1, %v761_v0 }
  0x5c   :  { %573 = vmatpush3.msra.mxu0 %v301_v57  ;;  %635 = vmatprep.mubr.msk.f32.mxu1 %vm762_vm1, %v761_v0 }
  0x5d   :  { %574 = vmatprep.subr.mxu0 %v761_v0  ;;  %604 = vmatpush3.msra.mxu1 %v399_v8 }
  0x5e   :  { %575 = vmatpush3.msra.mxu0 %v300_v58  ;;  %605 = vmatprep.subr.mxu1 %v761_v0 }
  0x5f   :  { %576 = vmatprep.subr.mxu0 %v761_v0  ;;  %606 = vmatpush3.msra.mxu1 %v398_v9 }
  0x60   :  { %577 = vmatpush3.msra.mxu0 %v299_v59  ;;  %607 = vmatprep.subr.mxu1 %v761_v0 }
  0x61   :  { %578 = vmatprep.subr.mxu0 %v761_v0  ;;  %608 = vmatpush3.msra.mxu1 %v397_v10 }
  0x62   :  { %579 = vmatpush3.msra.mxu0 %v298_v60  ;;  %609 = vmatprep.subr.mxu1 %v761_v0 }
  0x63   :  { %580 = vmatprep.subr.mxu0 %v761_v0  ;;  %610 = vmatpush3.msra.mxu1 %v396_v11 }
  0x64   :  { %581 = vmatpush3.msra.mxu0 %v297_v61  ;;  %611 = vmatprep.subr.mxu1 %v761_v0 }
  0x65   :  { %582 = vmatprep.subr.mxu0 %v761_v0  ;;  %612 = vmatpush3.msra.mxu1 %v395_v12 }
  0x66   :  { %583 = vmatpush3.msra.mxu0 %v296_v62  ;;  %613 = vmatprep.subr.mxu1 %v761_v0 }
  0x67   :  { %584 = vmatprep.subr.mxu0 %v761_v0  ;;  %614 = vmatpush3.msra.mxu1 %v394_v13 }
  0x68   :  { %585 = vmatpush3.msra.mxu0 %v295_v63  ;;  %615 = vmatprep.subr.mxu1 %v761_v0 }
  0x69   :  { %586 = vmatprep.subr.mxu0 %v761_v0  ;;  %616 = vmatpush3.msra.mxu1 %v393_v14 }
  0x6a   :  { %587 = vmatpush3.msra.mxu0 %v294_v1  ;;  %617 = vmatprep.subr.mxu1 %v761_v0 }
  0x6b   :  { %588 = vmatprep.subr.mxu0 %v761_v0  ;;  %618 = vmatpush3.msra.mxu1 %v392_v15 }
  0x6c   :  { %589 = vmatpush3.msra.mxu0 %v293_v2  ;;  %619 = vmatprep.subr.mxu1 %v761_v0 }
  0x6d   :  { %590 = vmatprep.subr.mxu0 %v761_v0  ;;  %620 = vmatpush3.msra.mxu1 %v391_v16 }
  0x6e   :  { %591 = vmatpush3.msra.mxu0 %v292_v3  ;;  %621 = vmatprep.subr.mxu1 %v761_v0 }
  0x6f   :  { %592 = vmatprep.subr.mxu0 %v761_v0  ;;  %622 = vmatpush3.msra.mxu1 %v390_v17 }
  0x70   :  { %593 = vmatpush3.msra.mxu0 %v291_v4  ;;  %623 = vmatprep.subr.mxu1 %v761_v0 }
  0x71   :  { %594 = vmatprep.subr.mxu0 %v761_v0  ;;  %624 = vmatpush3.msra.mxu1 %v389_v18 }
  0x72   :  { %595 = vmatpush3.msra.mxu0 %v290_v5  ;;  %625 = vmatprep.subr.mxu1 %v761_v0 }
  0x73   :  { %596 = vmatprep.subr.mxu0 %v761_v0  ;;  %626 = vmatpush3.msra.mxu1 %v388_v19 }
  0x74   :  { %597 = vmatpush3.msra.mxu0 %v289_v6  ;;  %627 = vmatprep.subr.mxu1 %v761_v0 }
  0x75   :  { %598 = vmatprep.subr.mxu0 %v761_v0  ;;  %628 = vmatpush3.msra.mxu1 %v387_v20 }
  0x76   :  { %599 = vmatpush3.msra.mxu0 %v288_v7  ;;  %629 = vmatprep.subr.mxu1 %v761_v0 }
  0x77   :  { %630 = vmatpush3.msra.mxu1 %v386_v31 }
  0x78   :  { %631 = vmatprep.subr.mxu1 %v761_v0 }
  0x79   :  { %632 = vmatpush3.msra.mxu1 %v385_v32 }
  0x7a   :  { %633 = vmatprep.subr.mxu1 %v761_v0 }
  0x7b   :  { %634 = vmatpush3.msra.mxu1 %v384_v33 }
 0x115   :  { %v531_v21 = vpop.f32.mrf.mxu0 }
 0x117   :  { %v532_v22 = vpop.f32.mrf.mxu0 }
 0x118   :  { %v533_v24 = vadd.f32 %v532_v22, %v531_v21 }
 0x119   :  { %v281_v25 = vpop.f32.mrf.mxu1 }
 0x11a   :  { %v212_v26 = vadd.f32 %v533_v24, %v495_v23 }
 0x11b   :  { %v283_v27 = vpop.f32.mrf.mxu1 }
 0x11c   :  { %v282_v28 = vadd.f32 %v281_v25, %v212_v26 }
 0x11e   :  { %vm285_vm2 = vcmp.gt.f32.partialorder %v282_v28, 0.0  ;;  %v286_v29 = vmul.f32 0.01, %v282_v28 }
 0x120   :  { %v287_v30 = vsel %vm285_vm2, %v282_v28, %v286_v29 }
 0x121   :  { %601 = vmatmul.mubr.f32.vlgmr.msra.gmra.mxu0 %v287_v30 }
 0x1e1   :  { %v377_v35 = vpop.f32.mrf.mxu0 }
 0x1e2   :  { %v378_v36 = vadd.f32 %v497_v34, %v377_v35 }
 0x1e3   :  { %v602_v37 = vpop.f32.mrf.mxu0 }
 0x1e4   :  { %vm381_vm3 = vcmp.gt.f32.partialorder %v378_v36, 0.0  ;;  %v382_v38 = vmul.f32 0.01, %v378_v36 }
 0x1e6   :  { %v383_v39 = vsel %vm381_vm3, %v378_v36, %v382_v38 }
 0x1e7   :  { %636 = vmatmul.mubr.f32.vlgmr.msra.gmra.mxu1 %v383_v39 }
 0x2a7   :  { %v473_v41 = vpop.f32.mrf.mxu1 }
 0x2a8   :  { %v474_v0 = vadd.f32 %v498_v40, %v473_v41 }
 0x2a9   :  { %v637_v42 = vpop.f32.mrf.mxu1 }
 0x2aa   :  { %477 = vst [vmem:[#allocation10] sm:$0xff] %v474_v0 }
 0x2ab   :  { %738 = shalt.err (!%p735_p10)
}
 0x2ac   :  { %487 = dma.vmem_to_hbm [thread:$0]  %s485_s25, 128, %s896_s7, [#allocation4]  }
 0x2ad   :  { %753 = dma.done.wait [#allocation4], 128  }
 0x2ae   :  { %754 = vsyncadd [#allocation4], 4294967168 }
 0x2af   :  { %491 = vsyncpa [#allocation3], 1 }
 0x2b0   :  { %492 = vsyncpa [#allocation6], 1 }
 0x2b1   :  { %493 = vsyncpa [#allocation9], 1 }
 0x2b2   :  { %494 = vsyncpa [#allocation4], 1 }

</bundles_post_ra>
